<compile_context>
chip_gen: v7x
topology: tpu7x:2x2x1
jax: 0.10.0
libtpu: 0.0.40
codegen_flags: <defaults>
</compile_context>

<pallas_src>
import jax
import jax.numpy as jnp
from jax import lax
from jax.experimental import pallas as pl
from jax.experimental.pallas import tpu as pltpu


def _make_soft_dice_kernel(rows, rb, a, steps_per_shard, tail_possible):
    """Build the per-shard streaming-reduction kernel.

    rows            : valid rows (of 128 lanes) in the (rows, 128) input view
    rb              : rows per grid-step block
    a               : rows per sub-accumulator (breaks the serial vadd chain)
    steps_per_shard : reduction steps per shard (inner grid axis extent)
    tail_possible   : static bool, True iff some step can overrun `rows`
    """

    def kernel(x_ref, y_ref, out_ref, acc_ref):
        s = pl.program_id(0)
        j = pl.program_id(1)

        @pl.when(j == 0)
        def _init():
            acc_ref[...] = jnp.zeros_like(acc_ref)

        def accumulate(x, y):
            # (rb,128) -> (rb//a, a, 128): tile-aligned reshape (free).  The
            # axis-0 reduction interleaves a//8 independent vreg accumulation
            # chains, so VPU latency stays hidden under the block DMA.
            xr = x.reshape(rb // a, a, 128)
            yr = y.reshape(rb // a, a, 128)
            acc_ref[0] += jnp.sum(xr * yr, axis=0)   # intersection partials
            acc_ref[1] += jnp.sum(xr + yr, axis=0)   # m1.sum()+m2.sum() partials

        # Nominal (unclamped) block id / row offset of this step.  The index
        # map clamps the DMA to the last real block, so a duplicate trailing
        # step and the ragged boundary block are both neutralised by masking.
        blk = s * steps_per_shard + j
        row_start = blk * rb

        if tail_possible:
            needs_mask = row_start + rb > rows

            @pl.when(jnp.logical_not(needs_mask))
            def _full():
                accumulate(x_ref[...].astype(jnp.float32),
                           y_ref[...].astype(jnp.float32))

            @pl.when(needs_mask)
            def _masked():
                row_ids = lax.broadcasted_iota(jnp.int32, (rb, 128), 0)
                valid = (row_start + row_ids) < rows
                x = jnp.where(valid, x_ref[...].astype(jnp.float32), 0.0)
                y = jnp.where(valid, y_ref[...].astype(jnp.float32), 0.0)
                accumulate(x, y)
        else:
            accumulate(x_ref[...].astype(jnp.float32),
                       y_ref[...].astype(jnp.float32))

        @pl.when(j == pl.num_programs(1) - 1)
        def _finalize():
            out_ref[0] = acc_ref[...]

    return kernel


def soft_dice_loss(logits, targets, *, target_block_bytes=4 * 1024 * 1024):
    """Pallas implementation of SoftDiceLoss().forward(logits, targets)."""
    assert logits.shape == targets.shape
    num = targets.shape[0]
    smooth = 1.0

    # Global sums are order independent: flatten (free reshape), keep original
    # dtype in HBM and view the stream as lane-dense (rows, 128).
    x = logits.reshape(-1)
    y = targets.reshape(-1)
    total = x.shape[0]

    lane = 128
    rows = pl.cdiv(total, lane)
    padded_total = rows * lane
    if padded_total != total:
        # Only a sub-128-element tail pad can fire (zeros are sum-safe); block
        # raggedness is handled in-kernel, never by padding.
        # TODO(synk): even this tiny-tail pad costs one XLA copy; fold it into
        # the kernel with a pl.ANY input + manual DMA if it ever matters.
        x = jnp.pad(x, (0, padded_total - total))
        y = jnp.pad(y, (0, padded_total - total))
    x = x.reshape(rows, lane)
    y = y.reshape(rows, lane)

    itemsize = max(x.dtype.itemsize, y.dtype.itemsize)
    # ~4 MiB per input per pipeline buffer (tunable): 2 inputs x 2 buffers x
    # 4 MiB = 16 MiB of VMEM buffers -> fits v7x's 64 MiB physical VMEM with
    # headroom while amortising the ~0.35 us per-step pipeline overhead on the
    # 128 MiB v5e/v6e parts.  (v5e/v6e can go to 8 MiB; keep <= ~6 MiB on v7x.)
    rb_target = max(8, (target_block_bytes // (lane * itemsize)) // 8 * 8)
    if rows <= rb_target:
        rb = rows            # single block == full leading dim (any size OK)
        n_blocks = 1
    else:
        rb = rb_target       # multiple of 8 -> (8,128)-aligned blocks
        n_blocks = pl.cdiv(rows, rb)

    # Shard the reduction so v7x's two TensorCores can each stream half the
    # input; harmless (serial) on single-core v5e/v6e.
    num_shards = 2 if n_blocks >= 2 else 1
    steps_per_shard = pl.cdiv(n_blocks, num_shards)
    # Static: can any grid step's nominal row range overrun `rows`?
    tail_possible = num_shards * steps_per_shard * rb > rows

    # Sub-accumulator height: a = 64 rows -> 8 independent (8,128) vreg chains.
    a = rb
    for cand in (64, 32, 16, 8):
        if rb % cand == 0:
            a = cand
            break

    kernel = _make_soft_dice_kernel(rows, rb, a, steps_per_shard, tail_possible)

    def in_map(s, j):
        # Clamp so a trailing duplicate step re-reads the last real block
        # instead of issuing an out-of-bounds DMA; its contribution is masked
        # to zero inside the kernel.
        return (jnp.minimum(s * steps_per_shard + j, n_blocks - 1), 0)

    partials = pl.pallas_call(
        kernel,
        out_shape=jax.ShapeDtypeStruct((num_shards, 2, a, lane), jnp.float32),
        grid_spec=pltpu.PrefetchScalarGridSpec(
            num_scalar_prefetch=0,
            grid=(num_shards, steps_per_shard),
            in_specs=[
                # TODO(synk): if an xprof trace shows exposed DMA at step
                # boundaries on v7x, add pipeline_mode=pl.Buffered(3) here.
                pl.BlockSpec((rb, lane), in_map),
                pl.BlockSpec((rb, lane), in_map),
            ],
            out_specs=pl.BlockSpec((1, 2, a, lane), lambda s, j: (s, 0, 0, 0)),
            scratch_shapes=[pltpu.VMEM((2, a, lane), jnp.float32)],
        ),
        compiler_params=pltpu.CompilerParams(
            # TODO(synk): on v7x, confirm in xprof that the shard axis lands on
            # both TensorCores; if not, switch it to pltpu.CORE_PARALLEL.
            dimension_semantics=("parallel", "arbitrary"),
            vmem_limit_bytes=48 * 1024 * 1024,
        ),
    )(x, y)

    # Tiny epilogue: combine per-shard lane-wise partials and apply dice math.
    intersection = jnp.sum(partials[:, 0])
    union = jnp.sum(partials[:, 1])                 # == m1.sum() + m2.sum()
    score = (2.0 * intersection + smooth) / (union + smooth)
    return 1.0 - score / num


def _reference_soft_dice_loss(logits, targets):
    """Pure-JAX reference matching the PyTorch code exactly."""
    smooth = 1.0
    n = targets.shape[0]
    m1 = logits.reshape(n, -1).astype(jnp.float32)
    m2 = targets.reshape(n, -1).astype(jnp.float32)
    inter = jnp.sum(m1 * m2)
    score = (2.0 * inter + smooth) / (jnp.sum(m1) + jnp.sum(m2) + smooth)
    return 1.0 - score / n


if __name__ == "__main__":
    key = jax.random.PRNGKey(0)
    k1, k2 = jax.random.split(key)

    # NCHW inputs: batch=2, channels=4, spatial 16x16 (matches the PyTorch use).
    logits = jax.nn.sigmoid(jax.random.normal(k1, (2, 4, 16, 16), jnp.float32))
    targets = (jax.random.uniform(k2, (2, 4, 16, 16)) > 0.5).astype(jnp.float32)

    loss = jax.jit(soft_dice_loss)(logits, targets)
    loss = jax.block_until_ready(loss)

    ref = _reference_soft_dice_loss(logits, targets)
    assert jnp.allclose(loss, ref, rtol=1e-5, atol=1e-6), (loss, ref)

    print("KERNEL_OK")
</pallas_src>

<mosaic_0001>
module attributes {stable_mosaic.version = 11 : i64} {
  func.func @kernel(%arg0: i32, %arg1: i32, %arg2: memref<16x128xf32, #tpu.memory_space<vmem>>, %arg3: memref<16x128xf32, #tpu.memory_space<vmem>>, %arg4: memref<1x2x16x128xf32, #tpu.memory_space<vmem>>, %arg5: memref<2x16x128xf32, #tpu.memory_space<vmem>>) attributes {dimension_semantics = [#tpu.dimension_semantics<parallel>, #tpu.dimension_semantics<arbitrary>], iteration_bounds = array<i64: 1, 1>, scalar_prefetch = 0 : i64, scratch_operands = 1 : i64, tpu.core_type = #tpu.core_type<tc>, window_params = [{transform_indices = @transform_0, window_bounds = array<i64: 16, 128>}, {transform_indices = @transform_1, window_bounds = array<i64: 16, 128>}, {transform_indices = @transform_2, window_bounds = array<i64: 1, 2, 16, 128>}]} {
    %c0_i32 = arith.constant 0 : i32
    %0 = arith.cmpi eq, %arg1, %c0_i32 : i32
    %1 = arith.extui %0 : i1 to i32
    %c0_i32_0 = arith.constant 0 : i32
    %2 = arith.cmpi ne, %1, %c0_i32_0 : i32
    scf.if %2 {
      %cst_18 = arith.constant 0.000000e+00 : f32
      %26 = vector.broadcast %cst_18 : f32 to vector<2x16x128xf32>
      %c0_19 = arith.constant 0 : index
      %c0_20 = arith.constant 0 : index
      %c0_21 = arith.constant 0 : index
      %27 = vector.load %arg5[%c0_19, %c0_20, %c0_21] : memref<2x16x128xf32, #tpu.memory_space<vmem>>, vector<2x16x128xf32>
      tpu.vector_store %arg5[%c0_19, %c0_20, %c0_21], %26 {strides = array<i32>} : memref<2x16x128xf32, #tpu.memory_space<vmem>>, vector<2x16x128xf32>,
    } else {
    }
    %c0 = arith.constant 0 : index
    %c0_1 = arith.constant 0 : index
    %3 = vector.load %arg2[%c0, %c0_1] : memref<16x128xf32, #tpu.memory_space<vmem>>, vector<16x128xf32>
    %c0_2 = arith.constant 0 : index
    %c0_3 = arith.constant 0 : index
    %4 = vector.load %arg3[%c0_2, %c0_3] : memref<16x128xf32, #tpu.memory_space<vmem>>, vector<16x128xf32>
    %5 = vector.shape_cast %3 : vector<16x128xf32> to vector<1x16x128xf32>
    %6 = vector.shape_cast %4 : vector<16x128xf32> to vector<1x16x128xf32>
    %c0_4 = arith.constant 0 : index
    %c0_5 = arith.constant 0 : index
    %c0_6 = arith.constant 0 : index
    %7 = vector.load %arg5[%c0_4, %c0_5, %c0_6] : memref<2x16x128xf32, #tpu.memory_space<vmem>>, vector<1x16x128xf32>
    %8 = vector.shape_cast %7 : vector<1x16x128xf32> to vector<16x128xf32>
    %9 = arith.mulf %5, %6 : vector<1x16x128xf32>
    %cst = arith.constant dense<0.000000e+00> : vector<16x128xf32>
    %10 = vector.multi_reduction <add>, %9, %cst [0] : vector<1x16x128xf32> to vector<16x128xf32>
    %11 = arith.addf %8, %10 : vector<16x128xf32>
    %c0_7 = arith.constant 0 : index
    %c0_8 = arith.constant 0 : index
    %c0_9 = arith.constant 0 : index
    %12 = vector.load %arg5[%c0_7, %c0_8, %c0_9] : memref<2x16x128xf32, #tpu.memory_space<vmem>>, vector<1x16x128xf32>
    %13 = vector.shape_cast %12 : vector<1x16x128xf32> to vector<16x128xf32>
    %14 = vector.shape_cast %11 : vector<16x128xf32> to vector<1x16x128xf32>
    tpu.vector_store %arg5[%c0_7, %c0_8, %c0_9], %14 {strides = array<i32>} : memref<2x16x128xf32, #tpu.memory_space<vmem>>, vector<1x16x128xf32>,
    %c1 = arith.constant 1 : index
    %c0_10 = arith.constant 0 : index
    %c0_11 = arith.constant 0 : index
    %15 = vector.load %arg5[%c1, %c0_10, %c0_11] : memref<2x16x128xf32, #tpu.memory_space<vmem>>, vector<1x16x128xf32>
    %16 = vector.shape_cast %15 : vector<1x16x128xf32> to vector<16x128xf32>
    %17 = arith.addf %5, %6 : vector<1x16x128xf32>
    %cst_12 = arith.constant dense<0.000000e+00> : vector<16x128xf32>
    %18 = vector.multi_reduction <add>, %17, %cst_12 [0] : vector<1x16x128xf32> to vector<16x128xf32>
    %19 = arith.addf %16, %18 : vector<16x128xf32>
    %c1_13 = arith.constant 1 : index
    %c0_14 = arith.constant 0 : index
    %c0_15 = arith.constant 0 : index
    %20 = vector.load %arg5[%c1_13, %c0_14, %c0_15] : memref<2x16x128xf32, #tpu.memory_space<vmem>>, vector<1x16x128xf32>
    %21 = vector.shape_cast %20 : vector<1x16x128xf32> to vector<16x128xf32>
    %22 = vector.shape_cast %19 : vector<16x128xf32> to vector<1x16x128xf32>
    tpu.vector_store %arg5[%c1_13, %c0_14, %c0_15], %22 {strides = array<i32>} : memref<2x16x128xf32, #tpu.memory_space<vmem>>, vector<1x16x128xf32>,
    %c0_i32_16 = arith.constant 0 : i32
    %23 = arith.cmpi eq, %arg1, %c0_i32_16 : i32
    %24 = arith.extui %23 : i1 to i32
    %c0_i32_17 = arith.constant 0 : i32
    %25 = arith.cmpi ne, %24, %c0_i32_17 : i32
    scf.if %25 {
      %c0_18 = arith.constant 0 : index
      %c0_19 = arith.constant 0 : index
      %c0_20 = arith.constant 0 : index
      %26 = vector.load %arg5[%c0_18, %c0_19, %c0_20] : memref<2x16x128xf32, #tpu.memory_space<vmem>>, vector<2x16x128xf32>
      %c0_21 = arith.constant 0 : index
      %c0_22 = arith.constant 0 : index
      %c0_23 = arith.constant 0 : index
      %c0_24 = arith.constant 0 : index
      %27 = vector.load %arg4[%c0_21, %c0_22, %c0_23, %c0_24] : memref<1x2x16x128xf32, #tpu.memory_space<vmem>>, vector<1x2x16x128xf32>
      %28 = vector.shape_cast %27 : vector<1x2x16x128xf32> to vector<2x16x128xf32>
      %29 = vector.shape_cast %26 : vector<2x16x128xf32> to vector<1x2x16x128xf32>
      tpu.vector_store %arg4[%c0_21, %c0_22, %c0_23, %c0_24], %29 {strides = array<i32>} : memref<1x2x16x128xf32, #tpu.memory_space<vmem>>, vector<1x2x16x128xf32>,
    } else {
    }
    return
  }
  func.func @transform_0(%arg0: i32, %arg1: i32) -> (i32, i32) {
    %c1_i32 = arith.constant 1 : i32
    %0 = arith.muli %arg0, %c1_i32 : i32
    %1 = arith.addi %0, %arg1 : i32
    %c0_i32 = arith.constant 0 : i32
    %2 = arith.minsi %1, %c0_i32 : i32
    %c0_i32_0 = arith.constant 0 : i32
    %c0_i32_1 = arith.constant 0 : i32
    return %2, %c0_i32_0 : i32, i32
  }
  func.func @transform_1(%arg0: i32, %arg1: i32) -> (i32, i32) {
    %c1_i32 = arith.constant 1 : i32
    %0 = arith.muli %arg0, %c1_i32 : i32
    %1 = arith.addi %0, %arg1 : i32
    %c0_i32 = arith.constant 0 : i32
    %2 = arith.minsi %1, %c0_i32 : i32
    %c0_i32_0 = arith.constant 0 : i32
    %c0_i32_1 = arith.constant 0 : i32
    return %2, %c0_i32_0 : i32, i32
  }
  func.func @transform_2(%arg0: i32, %arg1: i32) -> (i32, i32, i32, i32) {
    %c0_i32 = arith.constant 0 : i32
    %c0_i32_0 = arith.constant 0 : i32
    %c0_i32_1 = arith.constant 0 : i32
    %c0_i32_2 = arith.constant 0 : i32
    return %arg0, %c0_i32, %c0_i32_0, %c0_i32_1 : i32, i32, i32, i32
  }
}

</mosaic_0001>

<bundles_post_ra>
// kernel: soft_dice_loss.1
= control target key start
LH: loop header
LB: loop body
LE: loop exit
PB: predicated region body
PF: predicated region fallthrough
CT: control target
= control target key end

     0   :  { %s174_s0 = inlined_call_operand.vmem [shape: f32[16,128], index: 0, kind: input, shape index: {}]   ;;  %s175_s1 = inlined_call_operand.vmem [shape: f32[16,128], index: 1, kind: input, shape index: {}]   ;;  %s176_s2 = inlined_call_operand.vmem [shape: f32[1,2,16,128], index: 2, kind: output, shape index: {}]  }
   0x1   :  { %v83_v0 = vld [vmem:[%s174_s0] sm:$0xff]  ;;  %v84_v2 = vld [vmem:[%s174_s0 + $0x8] sm:$0xff] }
   0x2   :  { %v85_v1 = vld [vmem:[%s175_s1] sm:$0xff]  ;;  %v86_v4 = vld [vmem:[%s175_s1 + $0x8] sm:$0xff] }
   0x3   :  { %v89_v3 = vmul.f32 %v85_v1, %v83_v0  ;;  %v100_v5 = vadd.f32 %v85_v1, %v83_v0  ;;  %v90_v6 = vmul.f32 %v86_v4, %v84_v2  ;;  %v101_v7 = vadd.f32 %v86_v4, %v84_v2 }
   0x5   :  { %115 = vst [vmem:[%s176_s2] sm:$0xff] %v89_v3  ;;  %117 = vst [vmem:[%s176_s2 + $0x10] sm:$0xff] %v100_v5 }
   0x6   :  { %116 = vst [vmem:[%s176_s2 + $0x8] sm:$0xff] %v90_v6  ;;  %118 = vst [vmem:[%s176_s2 + $0x18] sm:$0xff] %v101_v7 }

</bundles_post_ra>
